<compile_context>
chip_gen: v6e
topology: v6e:2x2x1
jax: 0.10.0
libtpu: 0.0.40
codegen_flags: <defaults>
</compile_context>

<pallas_src>
import jax
import jax.numpy as jnp
from jax.experimental import pallas as pl
from jax.experimental.pallas import tpu as pltpu


def _attention_kernel(u_ref, enc_ref, ww_ref, wb_ref, vw_ref, vb_ref,
                      ctx_ref, attn_ref):
    # Per grid step (one batch tile of TB elements):
    #   u_ref   : (TB, H)    precomputed Uatt(hidden[-1]) + b   (f32)
    #   enc_ref : (TB, S, H) encoder outputs (f32 or bf16)
    #   ww_ref  : (H, H)     Watt weight, [in, out] layout
    #   wb_ref  : (1, H)     Watt bias (f32)
    #   vw_ref  : (1, H)     Vatt weight row (f32)
    #   vb_ref  : (1, 1)     Vatt bias scalar (SMEM, f32)
    #   ctx_ref : (TB, H)    context output (f32)
    #   attn_ref: (TB, S)    attention weights output (f32, lane-dense)
    enc = enc_ref[...]                                            # (TB, S, H)

    # Watt projection: batched MXU contraction over H, f32 accumulation.
    w = jnp.einsum("bsh,hk->bsk", enc, ww_ref[...],
                   preferred_element_type=jnp.float32)            # (TB, S, H)
    w = w + wb_ref[...]                                           # + bias

    # tanh(Uatt(h) + Watt(enc)) — EUP, overlapped with next tile's DMA/matmul.
    combined = jnp.tanh(w + u_ref[...][:, None, :])               # (TB, S, H)

    # Vatt(combined) -> energy (TB, S): lane (H) reduction + SMEM scalar bias.
    energy = jnp.sum(combined * vw_ref[...], axis=-1) + vb_ref[0, 0]

    # Softmax over the source-length axis (lane axis of (TB, S)).
    m = jnp.max(energy, axis=-1, keepdims=True)                   # (TB, 1)
    p = jnp.exp(energy - m)                                       # (TB, S)
    denom = jnp.sum(p, axis=-1, keepdims=True)                    # (TB, 1)
    attn = p / denom                                              # exact normalize
    attn_ref[...] = attn

    # context = attn @ encoder_outputs, batched MXU contraction over S.
    ctx = jnp.einsum("bqs,bsh->bqh",
                     attn[:, None, :].astype(enc.dtype), enc,
                     preferred_element_type=jnp.float32)          # (TB, 1, H)
    ctx_ref[...] = ctx[:, 0, :].astype(ctx_ref.dtype)


def _choose_batch_tile(B):
    """Whole batch for tiny B (blocks == full dims, no masked stores);
    otherwise the largest sublane-aligned (multiple-of-8) tile dividing B
    that still leaves >= 2 grid steps for megacore sharding."""
    if B <= 8:
        return B
    for tb in (128, 64, 32, 16, 8):
        if B % tb == 0 and B // tb >= 2:
            return tb
    return B


def attention_forward(hidden, encoder_outputs, params, *, use_bf16_matmul=False):
    """Pallas implementation of Attention.forward.

    hidden: [num_layers, B, H] array (or tuple (h, c) like an LSTM state)
    encoder_outputs: [B, S, H]
    returns (context [B, H], attention_weights [B, S])
    """
    if isinstance(hidden, tuple):
        hidden_state = hidden[0][-1]
    else:
        hidden_state = hidden[-1]                                 # (B, H)

    B, S, H = encoder_outputs.shape

    # Hoisted Uatt projection: one (B,H)@(H,H) matmul for the whole batch.
    u = (hidden_state.astype(jnp.float32) @ params["Uatt_w"].T
         + params["Uatt_b"]).astype(jnp.float32)                  # (B, H)

    compute_dtype = jnp.bfloat16 if use_bf16_matmul else jnp.float32
    enc = encoder_outputs.astype(compute_dtype)                   # (B, S, H)
    ww = params["Watt_w"].T.astype(compute_dtype)                 # (H, H) [in,out]
    wb = params["Watt_b"][None, :].astype(jnp.float32)            # (1, H)
    vw = params["Vatt_w"].astype(jnp.float32)                     # (1, H)
    vb = params["Vatt_b"].reshape(1, 1).astype(jnp.float32)       # (1, 1) -> SMEM

    TB = _choose_batch_tile(B)
    grid = (B // TB,)

    # VMEM budget: double-buffered input blocks + resident weights + outputs.
    isz = jnp.dtype(compute_dtype).itemsize
    est = (2 * TB * S * H * isz          # encoder_outputs block
           + 2 * TB * H * 4              # u block
           + 2 * H * H * isz             # Watt weight (constant index_map)
           + 2 * 2 * H * 4               # Watt bias + Vatt row
           + 2 * (TB * H + TB * S) * 4)  # output blocks
    vmem_limit = int(min(max(4 * est, 16 * 1024 * 1024), 48 * 1024 * 1024))

    # TODO(synk): add an S-tiled path (tile the Watt matmul over S with an
    # online-softmax reduction) before scaling to very long source lengths.
    ctx, attn = pl.pallas_call(
        _attention_kernel,
        out_shape=(
            jax.ShapeDtypeStruct((B, H), jnp.float32),
            jax.ShapeDtypeStruct((B, S), jnp.float32),
        ),
        grid_spec=pltpu.PrefetchScalarGridSpec(
            num_scalar_prefetch=0,
            grid=grid,
            in_specs=[
                pl.BlockSpec((TB, H), lambda b: (b, 0)),          # Uatt(h)+b
                pl.BlockSpec((TB, S, H), lambda b: (b, 0, 0)),    # encoder_outputs
                pl.BlockSpec((H, H), lambda b: (0, 0)),           # Watt W^T
                pl.BlockSpec((1, H), lambda b: (0, 0)),           # Watt b
                pl.BlockSpec((1, H), lambda b: (0, 0)),           # Vatt W
                pl.BlockSpec(memory_space=pltpu.MemorySpace.SMEM),  # Vatt b
            ],
            out_specs=[
                pl.BlockSpec((TB, H), lambda b: (b, 0)),          # context
                pl.BlockSpec((TB, S), lambda b: (b, 0)),          # attn (lane-dense)
            ],
        ),
        compiler_params=pltpu.CompilerParams(
            dimension_semantics=("parallel",),
            vmem_limit_bytes=vmem_limit),
    )(u, enc, ww, wb, vw, vb)

    return ctx, attn


def attention_reference(hidden, encoder_outputs, params):
    """Pure-JAX reference matching the PyTorch forward exactly."""
    if isinstance(hidden, tuple):
        hidden_state = hidden[0][-1]
    else:
        hidden_state = hidden[-1]
    h = hidden_state[:, None, :]                                         # (B,1,H)
    u = h @ params["Uatt_w"].T + params["Uatt_b"]                        # (B,1,H)
    w = encoder_outputs @ params["Watt_w"].T + params["Watt_b"]          # (B,S,H)
    combined = jnp.tanh(u + w)
    energy = (combined @ params["Vatt_w"].T + params["Vatt_b"])[..., 0]  # (B,S)
    attn = jax.nn.softmax(energy, axis=1)
    context = jnp.einsum("bs,bsh->bh", attn, encoder_outputs)
    return context, attn


def init_params(key, hidden_size):
    ks = jax.random.split(key, 6)
    bound = 1.0 / jnp.sqrt(hidden_size)
    return {
        "Uatt_w": jax.random.uniform(ks[0], (hidden_size, hidden_size),
                                     jnp.float32, -bound, bound),
        "Uatt_b": jax.random.uniform(ks[1], (hidden_size,), jnp.float32, -bound, bound),
        "Watt_w": jax.random.uniform(ks[2], (hidden_size, hidden_size),
                                     jnp.float32, -bound, bound),
        "Watt_b": jax.random.uniform(ks[3], (hidden_size,), jnp.float32, -bound, bound),
        "Vatt_w": jax.random.uniform(ks[4], (1, hidden_size), jnp.float32, -bound, bound),
        "Vatt_b": jax.random.uniform(ks[5], (1,), jnp.float32, -bound, bound),
    }


if __name__ == "__main__":
    B, S, H, NUM_LAYERS = 2, 8, 32, 2
    key = jax.random.PRNGKey(0)
    k_param, k_hid, k_enc = jax.random.split(key, 3)

    params = init_params(k_param, H)
    hidden = jax.random.normal(k_hid, (NUM_LAYERS, B, H), jnp.float32)
    encoder_outputs = jax.random.normal(k_enc, (B, S, H), jnp.float32)

    ctx_ref, attn_ref = attention_reference(hidden, encoder_outputs, params)

    # f32 path (default).
    ctx, attn = attention_forward(hidden, encoder_outputs, params)
    ctx, attn = jax.block_until_ready((ctx, attn))
    assert ctx.shape == (B, H) and attn.shape == (B, S)
    assert jnp.allclose(ctx, ctx_ref, atol=1e-3, rtol=1e-3)
    assert jnp.allclose(attn, attn_ref, atol=1e-3, rtol=1e-3)
    assert jnp.allclose(jnp.sum(attn, axis=1), jnp.ones((B,)), atol=1e-2)

    # bf16 MXU path (v6e/v7x): halves enc/Watt HBM traffic, f32 accumulation.
    ctx_b, attn_b = attention_forward(hidden, encoder_outputs, params,
                                      use_bf16_matmul=True)
    ctx_b, attn_b = jax.block_until_ready((ctx_b, attn_b))
    assert jnp.allclose(ctx_b, ctx_ref, atol=1e-1, rtol=1e-1)
    assert jnp.allclose(attn_b, attn_ref, atol=1e-1, rtol=1e-1)

    print("KERNEL_OK")
</pallas_src>

<mosaic_0001>
module attributes {stable_mosaic.version = 11 : i64} {
  func.func @_attention_kernel(%arg0: i32, %arg1: memref<2x32xf32, #tpu.memory_space<vmem>>, %arg2: memref<2x8x32xf32, #tpu.memory_space<vmem>>, %arg3: memref<32x32xf32, #tpu.memory_space<vmem>>, %arg4: memref<1x32xf32, #tpu.memory_space<vmem>>, %arg5: memref<1x32xf32, #tpu.memory_space<vmem>>, %arg6: memref<1x1xf32, #tpu.memory_space<smem>>, %arg7: memref<2x32xf32, #tpu.memory_space<vmem>>, %arg8: memref<2x8xf32, #tpu.memory_space<vmem>>) attributes {dimension_semantics = [#tpu.dimension_semantics<parallel>], iteration_bounds = array<i64: 1>, scalar_prefetch = 0 : i64, scratch_operands = 0 : i64, tpu.core_type = #tpu.core_type<tc>, window_params = [{transform_indices = @transform_0, window_bounds = array<i64: 2, 32>}, {transform_indices = @transform_1, window_bounds = array<i64: 2, 8, 32>}, {pipeline_mode = #tpu.pipeline_mode<synchronous>, transform_indices = @transform_2, window_bounds = array<i64: 32, 32>}, {pipeline_mode = #tpu.pipeline_mode<synchronous>, transform_indices = @transform_3, window_bounds = array<i64: 1, 32>}, {pipeline_mode = #tpu.pipeline_mode<synchronous>, transform_indices = @transform_4, window_bounds = array<i64: 1, 32>}, {transform_indices = @transform_5, window_bounds = array<i64: 1, 1>}, {transform_indices = @transform_6, window_bounds = array<i64: 2, 32>}, {transform_indices = @transform_7, window_bounds = array<i64: 2, 8>}]} {
    %c0 = arith.constant 0 : index
    %c0_0 = arith.constant 0 : index
    %c0_1 = arith.constant 0 : index
    %0 = vector.load %arg2[%c0, %c0_0, %c0_1] : memref<2x8x32xf32, #tpu.memory_space<vmem>>, vector<2x8x32xf32>
    %c0_2 = arith.constant 0 : index
    %c0_3 = arith.constant 0 : index
    %1 = vector.load %arg3[%c0_2, %c0_3] : memref<32x32xf32, #tpu.memory_space<vmem>>, vector<32x32xf32>
    "tpu.trace_start"() <{level = 10 : i32, message = "bsh,hk->bsk"}> : () -> ()
    %cst = arith.constant dense<0.000000e+00> : vector<2x8x32xf32>
    %2 = tpu.matmul %0, %1, %cst {dimension_numbers = #tpu.dot_dimension_numbers<[2], [0], [0, 1], [1], [0, 0, 0, 1, 1, 1], [], []>} : vector<2x8x32xf32>, vector<32x32xf32>, vector<2x8x32xf32> -> vector<2x8x32xf32>
    "tpu.trace_stop"() : () -> ()
    %c0_4 = arith.constant 0 : index
    %c0_5 = arith.constant 0 : index
    %3 = vector.load %arg4[%c0_4, %c0_5] : memref<1x32xf32, #tpu.memory_space<vmem>>, vector<1x32xf32>
    %4 = vector.shape_cast %3 : vector<1x32xf32> to vector<1x1x32xf32>
    %5 = vector.broadcast %4 : vector<1x1x32xf32> to vector<2x8x32xf32>
    %6 = arith.addf %2, %5 : vector<2x8x32xf32>
    %c0_6 = arith.constant 0 : index
    %c0_7 = arith.constant 0 : index
    %7 = vector.load %arg1[%c0_6, %c0_7] : memref<2x32xf32, #tpu.memory_space<vmem>>, vector<2x32xf32>
    %8 = vector.shape_cast %7 : vector<2x32xf32> to vector<2x1x32xf32>
    %9 = vector.broadcast %8 : vector<2x1x32xf32> to vector<2x8x32xf32>
    %10 = arith.addf %6, %9 : vector<2x8x32xf32>
    %11 = math.tanh %10 : vector<2x8x32xf32>
    %c0_8 = arith.constant 0 : index
    %c0_9 = arith.constant 0 : index
    %12 = vector.load %arg5[%c0_8, %c0_9] : memref<1x32xf32, #tpu.memory_space<vmem>>, vector<1x32xf32>
    %13 = vector.shape_cast %12 : vector<1x32xf32> to vector<1x1x32xf32>
    %14 = vector.broadcast %13 : vector<1x1x32xf32> to vector<2x8x32xf32>
    %15 = arith.mulf %11, %14 : vector<2x8x32xf32>
    %cst_10 = arith.constant dense<0.000000e+00> : vector<2x8xf32>
    %16 = vector.multi_reduction <add>, %15, %cst_10 [2] : vector<2x8x32xf32> to vector<2x8xf32>
    %c0_11 = arith.constant 0 : index
    %c0_12 = arith.constant 0 : index
    %17 = memref.load %arg6[%c0_11, %c0_12] : memref<1x1xf32, #tpu.memory_space<smem>>
    %18 = vector.broadcast %17 : f32 to vector<2x8xf32>
    %19 = arith.addf %16, %18 : vector<2x8xf32>
    %cst_13 = arith.constant dense<0xFF800000> : vector<2xf32>
    %20 = vector.multi_reduction <maximumf>, %19, %cst_13 [1] : vector<2x8xf32> to vector<2xf32>
    %21 = vector.shape_cast %20 : vector<2xf32> to vector<2x1xf32>
    %22 = vector.broadcast %21 : vector<2x1xf32> to vector<2x8xf32>
    %23 = arith.subf %19, %22 : vector<2x8xf32>
    %24 = math.exp %23 : vector<2x8xf32>
    %cst_14 = arith.constant dense<0.000000e+00> : vector<2xf32>
    %25 = vector.multi_reduction <add>, %24, %cst_14 [1] : vector<2x8xf32> to vector<2xf32>
    %26 = vector.shape_cast %25 : vector<2xf32> to vector<2x1xf32>
    %27 = vector.broadcast %26 : vector<2x1xf32> to vector<2x8xf32>
    %28 = arith.divf %24, %27 : vector<2x8xf32>
    %c0_15 = arith.constant 0 : index
    %c0_16 = arith.constant 0 : index
    %29 = vector.load %arg8[%c0_15, %c0_16] : memref<2x8xf32, #tpu.memory_space<vmem>>, vector<2x8xf32>
    tpu.vector_store %arg8[%c0_15, %c0_16], %28 {strides = array<i32>} : memref<2x8xf32, #tpu.memory_space<vmem>>, vector<2x8xf32>,
    %30 = vector.shape_cast %28 : vector<2x8xf32> to vector<2x1x8xf32>
    "tpu.trace_start"() <{level = 10 : i32, message = "bqs,bsh->bqh"}> : () -> ()
    %cst_17 = arith.constant dense<0.000000e+00> : vector<2x1x32xf32>
    %31 = tpu.matmul %30, %0, %cst_17 {dimension_numbers = #tpu.dot_dimension_numbers<[2], [1], [1], [2], [0, 0, 0, 1, 1, 2], [0], [0]>} : vector<2x1x8xf32>, vector<2x8x32xf32>, vector<2x1x32xf32> -> vector<2x1x32xf32>
    "tpu.trace_stop"() : () -> ()
    %32 = vector.shape_cast %31 : vector<2x1x32xf32> to vector<2x32xf32>
    %c0_18 = arith.constant 0 : index
    %c0_19 = arith.constant 0 : index
    %33 = vector.load %arg7[%c0_18, %c0_19] : memref<2x32xf32, #tpu.memory_space<vmem>>, vector<2x32xf32>
    tpu.vector_store %arg7[%c0_18, %c0_19], %32 {strides = array<i32>} : memref<2x32xf32, #tpu.memory_space<vmem>>, vector<2x32xf32>,
    return
  }
  func.func @transform_0(%arg0: i32) -> (i32, i32) {
    %c0_i32 = arith.constant 0 : i32
    %c0_i32_0 = arith.constant 0 : i32
    return %arg0, %c0_i32 : i32, i32
  }
  func.func @transform_1(%arg0: i32) -> (i32, i32, i32) {
    %c0_i32 = arith.constant 0 : i32
    %c0_i32_0 = arith.constant 0 : i32
    %c0_i32_1 = arith.constant 0 : i32
    return %arg0, %c0_i32, %c0_i32_0 : i32, i32, i32
  }
  func.func @transform_2(%arg0: i32) -> (i32, i32) {
    %c0_i32 = arith.constant 0 : i32
    %c0_i32_0 = arith.constant 0 : i32
    %c0_i32_1 = arith.constant 0 : i32
    return %c0_i32, %c0_i32_0 : i32, i32
  }
  func.func @transform_3(%arg0: i32) -> (i32, i32) {
    %c0_i32 = arith.constant 0 : i32
    %c0_i32_0 = arith.constant 0 : i32
    %c0_i32_1 = arith.constant 0 : i32
    return %c0_i32, %c0_i32_0 : i32, i32
  }
  func.func @transform_4(%arg0: i32) -> (i32, i32) {
    %c0_i32 = arith.constant 0 : i32
    %c0_i32_0 = arith.constant 0 : i32
    %c0_i32_1 = arith.constant 0 : i32
    return %c0_i32, %c0_i32_0 : i32, i32
  }
  func.func @transform_5(%arg0: i32) -> (i32, i32) {
    %c0_i32 = arith.constant 0 : i32
    %c0_i32_0 = arith.constant 0 : i32
    %c0_i32_1 = arith.constant 0 : i32
    return %c0_i32, %c0_i32_0 : i32, i32
  }
  func.func @transform_6(%arg0: i32) -> (i32, i32) {
    %c0_i32 = arith.constant 0 : i32
    %c0_i32_0 = arith.constant 0 : i32
    return %arg0, %c0_i32 : i32, i32
  }
  func.func @transform_7(%arg0: i32) -> (i32, i32) {
    %c0_i32 = arith.constant 0 : i32
    %c0_i32_0 = arith.constant 0 : i32
    return %arg0, %c0_i32 : i32, i32
  }
}

</mosaic_0001>

<bundles_post_ra>
// kernel: tpu_custom_call.1
= control target key start
LH: loop header
LB: loop body
LE: loop exit
PB: predicated region body
PF: predicated region fallthrough
CT: control target
= control target key end

     0   :  { %14 = vsyncpa [#allocation4], 0  ;;  %s736_s0 = inlined_call_operand.vmem [shape: f32[2,32], index: 0, kind: input, shape index: {}]   ;;  %s737_s1 = inlined_call_operand.hbm [shape: f32[2,8,32], index: 1, kind: input, shape index: {}]   ;;  %s738_s2 = inlined_call_operand.hbm [shape: f32[32,32], index: 2, kind: input, shape index: {}]   ;;  %s739_s3 = inlined_call_operand.vmem [shape: f32[1,32], index: 3, kind: input, shape index: {}]   ;;  %s740_s4 = inlined_call_operand.vmem [shape: f32[1,32], index: 4, kind: input, shape index: {}]   ;;  %s741_s5 = inlined_call_operand.<no memory space> [shape: f32[1,1], index: 5, kind: input, shape index: {}]   ;;  %s742_s6 = inlined_call_operand.hbm [shape: f32[2,32], index: 6, kind: output, shape index: {0}]   ;;  %s743_s7 = inlined_call_operand.hbm [shape: f32[2,8], index: 7, kind: output, shape index: {1}]  }
   0x1   :  { %15 = vsyncpa [#allocation7], 0 }
   0x2   :  { %16 = vsyncpa [#allocation5], 0 }
   0x3   :  { %17 = vsyncpa [#allocation10], 0  ;;  %s631_s24 = smov [#allocation3]  }
   0x4   :  { %s25_s25 = sshll.u32 %s631_s24, 4  ;;  %s26_s25 = int_to_ptr.vmem [resolvable:$true] %s25_s25 }
   0x5   :  { %s551_s26 = scalar_lea.vmem %s26_s25, 256  ;;  %p556_p1 = scmp.lt.s32.totalorder %s26_s25, %s26_s25 }
   0x6   :  { %p552_p0 = scmp.ne.s32.totalorder %s26_s25, %s551_s26  ;;  %p557_p2 = scmp.lt.s32.totalorder %s551_s26, %s551_s26 }
   0x8   :  { %p558_p3 = por %p557_p2, %p556_p1 }
   0xa   :  { %p559_p4 = pnand %p558_p3, %p552_p0 }
   0xc   :  { %562 = shalt.err (!%p559_p4)
}
   0xd   :  { %s632_s27 = smov 128   ;;  %s633_s28 = smov 8  }
   0xe   :  { %31 = dma.hbm_to_vmem [thread:$0]  %s737_s1, 256, %s26_s25, [#allocation4], %s632_s27, %s632_s27, %s633_s28  }
   0xf   :  { %s634_s8 = smov [#allocation6]  }
  0x10   :  { %s37_s9 = sshll.u32 %s634_s8, 4  ;;  %s38_s9 = int_to_ptr.vmem [resolvable:$true] %s37_s9 }
  0x11   :  { %s571_s10 = scalar_lea.vmem %s38_s9, 512  ;;  %p576_p6 = scmp.lt.s32.totalorder %s38_s9, %s38_s9 }
  0x12   :  { %p572_p5 = scmp.ne.s32.totalorder %s38_s9, %s571_s10  ;;  %p577_p7 = scmp.lt.s32.totalorder %s571_s10, %s571_s10 }
  0x14   :  { %p578_p8 = por %p577_p7, %p576_p6 }
  0x16   :  { %p579_p9 = pnand %p578_p8, %p572_p5 }
  0x18   :  { %582 = shalt.err (!%p579_p9)
}
  0x19   :  { %43 = dma.hbm_to_vmem [thread:$0]  %s738_s2, 512, %s38_s9, [#allocation7], %s632_s27, %s632_s27, %s633_s28  }
  0x1a   :  { %623 = dma.done.wait [#allocation4], 256  }
  0x1b   :  { %624 = vsyncadd [#allocation4], 4294967040 }
  0x1c   :  { %625 = dma.done.wait [#allocation7], 512  }
  0x1d   :  { %626 = vsyncadd [#allocation7], 4294966784  ;;  %vm69_vm0 = vcmask 261120   ;;  %v61_v0 = vld [vmem:[#allocation6 + $0x18] sm:$0xff]  ;;  %v60_v1 = vld [vmem:[#allocation6 + $0x10] sm:$0xff]  ;;  %v164_v8 = vlaneseq  ;;  %v205_v34 = vstv %s741_s5  ;;  %vm220_vm1 = vcmask 1041409  }
  0x1e   :  { %498 = vmatprep.subr.mxu0 %v61_v0  ;;  %v687_v2 = vld [vmem:[#allocation3] sm:$0xff]  ;;  %v59_v3 = vld [vmem:[#allocation6 + $0x8] sm:$0xff]  ;;  %v58_v4 = vld [vmem:[#allocation6] sm:$0xff]  ;;  %v635_v6 = vmov 1966171168   ;;  %vm223_vm2 = vcmask 58368  }
  0x1f   :  { %499 = vmatpush3.msra.mxu0 %v61_v0  ;;  %506 = vmatprep.mubr.msk.f32.mxu0 %vm69_vm0, %v687_v2  ;;  %v691_v5 = vld [vmem:[#allocation3 + $0x8] sm:$0xff]  ;;  %v162_v7 = vunpack.c.l.s4 %v635_v6  ;;  %v695_v10 = vshrl.u32 %v164_v8, 7  ;;  %v484_v11 = vld.sshfl [vmem:[%s736_s0] sm:$0x11 pattern:$0x75316420] }
  0x20   :  { %500 = vmatprep.subr.mxu0 %v60_v1  ;;  %v160_v12 = vcombine.high %v484_v11, %v484_v11  ;;  %v481_v17 = vld [vmem:[%s739_s3] ss:$0 sm:$0xff]  ;;  %v211_v33 = vand.u32 127, %v164_v8  ;;  %v636_v44 = vmov 0   ;;  %v637_v61 = vmov 0.0  }
  0x21   :  { %501 = vmatpush3.msra.mxu0 %v60_v1  ;;  %v163_v9 = vunpack.c.0.s8 %v162_v7  ;;  %v702_v15 = vsub.s32 0, %v695_v10  ;;  %v485_v28 = vld [vmem:[%s740_s4] ss:$0 sm:$0xff]  ;;  %530 = vset.pattern.permute.xlu0 %v636_v44  ;;  %v234_v45 = vsub.s32 1, %v695_v10  ;;  %vm638_vm3 = vmmov 0   ;;  %s639_s4 = smov [#allocation9]  }
  0x22   :  { %502 = vmatprep.subr.mxu0 %v59_v3  ;;  %v214_v36 = vsub.s32 %v211_v33, %v695_v10  ;;  %529 = vset.pattern.permute.xlu1 %v636_v44  ;;  %vm299_vm4 = vcmask 64512   ;;  %s467_s5 = sshll.u32 %s639_s4, 4  ;;  %s468_s5 = int_to_ptr.vmem [resolvable:$true] %s467_s5 }
  0x23   :  { %503 = vmatpush3.msra.mxu0 %v59_v3  ;;  %v166_v13 = vsub.s32 %v163_v9, %v695_v10  ;;  %509 = vmatprep.subr.mxu1 %v637_v61  ;;  %s583_s17 = scalar_lea.vmem %s468_s5, 32  ;;  %p588_p11 = scmp.lt.s32.totalorder %s468_s5, %s468_s5 }
  0x24   :  { %504 = vmatprep.subr.mxu0 %v58_v4  ;;  %510 = vmatpush3.msra.mxu1 %v687_v2  ;;  %p584_p10 = scmp.ne.s32.totalorder %s468_s5, %s583_s17  ;;  %p589_p12 = scmp.lt.s32.totalorder %s583_s17, %s583_s17 }
  0x25   :  { %505 = vmatpush3.msra.mxu0 %v58_v4  ;;  %v174_v14 = vrot.slane %v160_v12, %v166_v13  ;;  %v167_v16 = vrot.slane %v484_v11, %v166_v13  ;;  %514 = vmatprep.subr.mxu1 %v637_v61 }
  0x26   :  { %507 = vmatmul.mubr.msk.f32.vlgmr.msra.gmra.mxu0 %vm69_vm0, %v691_v5  ;;  %511 = vmatprep.mubr.msk.f32.mxu1 %vm638_vm3, %v637_v61  ;;  %p590_p13 = por %p589_p12, %p588_p11 }
  0x27   :  { %v182_v18 = vrot.slane %v174_v14, %v702_v15  ;;  %v178_v21 = vrot.slane %v167_v16, %v702_v15 }
  0x28   :  { %p591_p0 = pnand %p590_p13, %p584_p10 }
  0xe6   :  { %v508_v19 = vpop.f32.mrf.mxu0 }
  0xe7   :  { %v148_v20 = vadd.f32 %v508_v19, %v481_v17 }
  0xe8   :  { %v142_v22 = vpop.f32.mrf.mxu0 }
  0xe9   :  { %v186_v23 = vadd.f32 %v182_v18, %v148_v20  ;;  %v143_v24 = vadd.f32 %v481_v17, %v142_v22 }
  0xeb   :  { %v185_v25 = vadd.f32 %v178_v21, %v143_v24  ;;  %531 = vtanh.f32 %v186_v23 }
  0xed   :  { %533 = vtanh.f32 %v185_v25 }
  0xf8   :  { %v532_v26 = vpop.eup %531 }
  0xf9   :  { %v197_v31 = vmul.f32 %v532_v26, %v485_v28 }
  0xfa   :  { %v534_v27 = vpop.eup %533 }
  0xfb   :  { %v196_v29 = vmul.f32 %v534_v27, %v485_v28  ;;  %v201_v32 = vsel %vm69_vm0, %v197_v31, 0.0 }
  0xfd   :  { %v198_v30 = vsel %vm69_vm0, %v196_v29, 0.0 }
  0xfe   :  { %199 = vadd.xlane.f32.xlu0 %v198_v30 }
 0x102   :  { %202 = vadd.xlane.f32.xlu0 %v201_v32 }
 0x187   :  { %v200_v35 = vpop.xlane.xlu0 %199 }
 0x188   :  { %v206_v37 = vadd.f32 %v205_v34, %v200_v35 }
 0x18a   :  { %v215_v40 = vrot.slane %v206_v37, %v214_v36 }
 0x18b   :  { %v203_v38 = vpop.xlane.xlu0 %202 }
 0x18c   :  { %v207_v39 = vadd.f32 %v205_v34, %v203_v38 }
 0x18e   :  { %v219_v41 = vrot.slane %v207_v39, %v214_v36 }
 0x190   :  { %v221_v42 = vsel %vm220_vm1, %v219_v41, %v215_v40 }
 0x191   :  { %v224_v43 = vsel %vm223_vm2, %v221_v42, -inf }
 0x192   :  { %225 = vmax.xlane.f32.xlu1 %v224_v43 }
 0x21b   :  { %v226_v46 = vpop.xlane.xlu1 %225 }
 0x21c   :  { %v231_v47 = vrot.slane %v226_v46, %v702_v15  ;;  %v235_v48 = vrot.slane %v226_v46, %v234_v45 }
 0x21e   :  { %v238_v49 = vsub.f32 %v206_v37, %v231_v47  ;;  %v239_v50 = vsub.f32 %v207_v39, %v235_v48 }
 0x220   :  { %v240_v51 = vmul.f32 1.442695, %v238_v49  ;;  %v242_v52 = vmul.f32 1.442695, %v239_v50 }
 0x222   :  { %535 = vpow2.f32 %v240_v51 }
 0x223   :  { %537 = vpow2.f32 %v242_v52 }
 0x22f   :  { %v536_v53 = vpop.eup %535 }
 0x230   :  { %v538_v54 = vpop.eup %537  ;;  %247 = vperm.xlu1 %529, %v536_v53  }
 0x231   :  { %250 = vperm.xlu0 %530, %v538_v54  }
 0x2ab   :  { %v248_v55 = vpop.permute.xlu1 %247 }
 0x2ac   :  { %v251_v56 = vpop.permute.xlu0 %250  ;;  %v255_v57 = vrot.slane %v248_v55, %v214_v36 }
 0x2ad   :  { %v259_v58 = vrot.slane %v251_v56, %v214_v36 }
 0x2af   :  { %v260_v59 = vsel %vm220_vm1, %v259_v58, %v255_v57 }
 0x2b0   :  { %v262_v60 = vsel %vm223_vm2, %v260_v59, 0.0 }
 0x2b1   :  { %263 = vadd.xlane.f32.xlu1 %v262_v60 }
 0x33a   :  { %v264_v62 = vpop.xlane.xlu1 %263 }
 0x33b   :  { %v269_v63 = vrot.slane %v264_v62, %v702_v15  ;;  %v273_v0 = vrot.slane %v264_v62, %v234_v45 }
 0x33d   :  { %539 = vrcp.f32 %v269_v63 }
 0x33e   :  { %541 = vrcp.f32 %v273_v0 }
 0x34a   :  { %v540_v1 = vpop.eup %539 }
 0x34b   :  { %v277_v3 = vmul.f32 %v540_v1, %v536_v53  ;;  %v542_v4 = vpop.eup %541 }
 0x34c   :  { %v279_v6 = vmul.f32 %v542_v4, %v538_v54 }
 0x34d   :  { %283 = vperm.xlu0 %530, %v277_v3  }
 0x351   :  { %286 = vperm.xlu0 %530, %v279_v6  }
 0x3c8   :  { %v284_v7 = vpop.permute.xlu0 %283 }
 0x3c9   :  { %v291_v8 = vrot.slane %v284_v7, %v214_v36 }
 0x3cb   :  { %512 = vmatmul.mubr.msk.f32.vlgmr.msra.gmra.mxu1 %vm299_vm4, %v291_v8 }
 0x3cc   :  { %515 = vmatpush3.msra.mxu1 %v691_v5  ;;  %v287_v2 = vpop.permute.xlu0 %286  ;;  %516 = vmatprep.mubr.msk.f32.mxu1 %vm638_vm3, %v637_v61 }
 0x3cd   :  { %v295_v9 = vrot.slane %v287_v2, %v214_v36 }
 0x3cf   :  { %517 = vmatmul.mubr.msk.f32.vlgmr.msra.gmra.mxu1 %vm299_vm4, %v295_v9  ;;  %v296_v10 = vsel %vm220_vm1, %v295_v9, %v291_v8 }
 0x3d0   :  { %298 = vst.msk [vmem:[#allocation9] sm:$0x3] %vm223_vm2, %v296_v10 }
 0x3d1   :  { %594 = shalt.err (!%p591_p0)
}
 0x3d2   :  { %470 = dma.vmem_to_hbm [thread:$0]  %s468_s5, 32, %s743_s7, [#allocation10]   ;;  %vm449_vm5 = vcmask 254976  }
 0x3d3   :  { %s640_s20 = smov [#allocation8]  }
 0x3d4   :  { %s457_s21 = sshll.u32 %s640_s20, 4  ;;  %s458_s21 = int_to_ptr.vmem [resolvable:$true] %s457_s21 }
 0x3d5   :  { %s603_s22 = scalar_lea.vmem %s458_s21, 32  ;;  %p608_p2 = scmp.lt.s32.totalorder %s458_s21, %s458_s21 }
 0x3d6   :  { %p604_p1 = scmp.ne.s32.totalorder %s458_s21, %s603_s22  ;;  %p609_p3 = scmp.lt.s32.totalorder %s603_s22, %s603_s22 }
 0x3d8   :  { %p610_p4 = por %p609_p3, %p608_p2 }
 0x3da   :  { %p611_p5 = pnand %p610_p4, %p604_p1 }
 0x48b   :  { %v368_v5 = vpop.f32.mrf.mxu1 }
 0x48d   :  { %v513_v11 = vpop.f32.mrf.mxu1 }
 0x48f   :  { %v440_v12 = vpop.f32.mrf.mxu1 }
 0x490   :  { %v446_v13 = vrot.slane %v440_v12, 7 }
 0x491   :  { %v518_v14 = vpop.f32.mrf.mxu1 }
 0x492   :  { %v447_v15 = vsel %vm220_vm1, %v446_v13, %v368_v5 }
 0x493   :  { %450 = vst.msk [vmem:[#allocation8] sm:$0x3] %vm449_vm5, %v447_v15 }
 0x494   :  { %614 = shalt.err (!%p611_p5)
}
 0x495   :  { %460 = dma.vmem_to_hbm [thread:$0]  %s458_s21, 32, %s742_s6, [#allocation5]  }
 0x496   :  { %627 = dma.done.wait [#allocation5], 32  }
 0x497   :  { %628 = vsyncadd [#allocation5], 4294967264 }
 0x498   :  { %629 = dma.done.wait [#allocation10], 32  }
 0x499   :  { %630 = vsyncadd [#allocation10], 4294967264 }
 0x49a   :  { %477 = vsyncpa [#allocation4], 1 }
 0x49b   :  { %478 = vsyncpa [#allocation7], 1 }
 0x49c   :  { %479 = vsyncpa [#allocation5], 1 }
 0x49d   :  { %480 = vsyncpa [#allocation10], 1 }

</bundles_post_ra>
